<compile_context>
chip_gen: v6e
topology: v6e:2x2x1
jax: 0.10.0
libtpu: 0.0.40
codegen_flags: <defaults>
</compile_context>

<pallas_src>
import functools

import jax
import jax.numpy as jnp
from jax.experimental import pallas as pl
from jax.experimental.pallas import tpu as pltpu


def _autoencoder_kernel(x_ref, w12_ref, b12_ref, w34_ref, b34_ref, o_ref, *,
                        compute_dtype):
    cd = compute_dtype
    x = x_ref[...].astype(cd)
    # Folded encoder (Linear-Linear) + ReLU: bf16 MXU, f32 accumulate, f32 epilogue.
    h = jnp.dot(x, w12_ref[...], preferred_element_type=jnp.float32) + b12_ref[...]
    h = jnp.maximum(h, 0.0)
    # Folded decoder (Linear-Linear).
    y = jnp.dot(h.astype(cd), w34_ref[...],
                preferred_element_type=jnp.float32) + b34_ref[...]
    o_ref[...] = y.astype(o_ref.dtype)


def _fold_params(params, compute_dtype, pack):
    """Fold the two bias-only-separated Linear pairs (exact in f32) and, if pack > 1,
    expand them block-diagonally so `pack` logical rows packed along the lane axis are
    processed independently: packed_x @ kron(I, W) == concat_of(per-row x @ W)."""
    f32 = jnp.float32
    w1, b1 = params["w1"].astype(f32), params["b1"].astype(f32)
    w2, b2 = params["w2"].astype(f32), params["b2"].astype(f32)
    w3, b3 = params["w3"].astype(f32), params["b3"].astype(f32)
    w4, b4 = params["w4"].astype(f32), params["b4"].astype(f32)
    w12 = w1 @ w2
    b12 = b1 @ w2 + b2
    w34 = w3 @ w4
    b34 = b3 @ w4 + b4
    if pack > 1:
        eye = jnp.eye(pack, dtype=f32)
        w12 = jnp.kron(eye, w12)
        w34 = jnp.kron(eye, w34)
        b12 = jnp.tile(b12, (1, pack))
        b34 = jnp.tile(b34, (1, pack))
    return w12.astype(compute_dtype), b12, w34.astype(compute_dtype), b34


@functools.partial(jax.jit, static_argnames=("block_b", "compute_dtype", "out_dtype"))
def autoencoder_forward(x, params, block_b=None, compute_dtype=jnp.bfloat16,
                        out_dtype=None):
    """Fused autoencoder forward pass.

    x: [B, input_dim]
    params: dict of w1..w4 stored (in_features, out_features) (so y = x @ W + b matches
            the PyTorch x @ W_t.T + b) and b1..b4 of shape (1, out_features).
    block_b: optional batch-tile size in *logical* rows.
    """
    B, D = x.shape
    out_dtype = x.dtype if out_dtype is None else out_dtype

    # Lane-density packing: fold `pack` logical rows into one 128-wide row (free
    # row-major reshape).  Fallback to pack=1 when D doesn't divide 128 evenly.
    pack = 1
    if D < 128 and 128 % D == 0 and B % (128 // D) == 0:
        pack = 128 // D
    Bp, Dp = B // pack, D * pack
    x_p = x.reshape(Bp, Dp)

    w12, b12, w34, b34 = _fold_params(params, compute_dtype, pack)
    Hp = w12.shape[1]

    x_isz = jnp.dtype(x.dtype).itemsize
    o_isz = jnp.dtype(out_dtype).itemsize
    cd_isz = jnp.dtype(compute_dtype).itemsize

    # Batch tile (in packed rows): target ~2 MiB of x per grid step so per-step HBM
    # time dominates the ~0.35us fixed step overhead.
    if block_b is not None:
        tbp = max(1, block_b // pack)
    else:
        tbp = max(8, ((2 << 20) // (Dp * x_isz)) // 8 * 8)
        # Prefer >= 2 balanced grid steps so v7x's 2 TensorCores both get work.
        if 1024 <= Bp <= 2 * tbp:
            tbp = ((Bp + 1) // 2 + 7) // 8 * 8
    tbp = min(tbp, Bp)
    if tbp < Bp:
        tbp = max(8, (tbp // 8) * 8)
    grid = (pl.cdiv(Bp, tbp),)

    def full_spec(arr):
        nd = arr.ndim
        return pl.BlockSpec(arr.shape, lambda i, _nd=nd: (0,) * _nd)

    # VMEM budget: double-buffered IO tiles + (conservatively double-buffered) weights
    # + in-kernel intermediates, capped below v7x's 64 MiB per-TC VMEM.
    weight_bytes = int((w12.size + w34.size) * cd_isz + (b12.size + b34.size) * 4)
    io_tile_bytes = tbp * Dp * (x_isz + o_isz)
    interm_bytes = tbp * (Dp * (cd_isz + 4 + o_isz) + Hp * (4 + cd_isz))
    needed = 2 * io_tile_bytes + 2 * weight_bytes + interm_bytes + (4 << 20)
    vmem_limit = int(min(max(needed, 16 << 20), 48 << 20))

    H = params["w2"].shape[1]
    flops = 2 * B * (D * H + H * D)           # folded-linear flops
    bytes_accessed = B * D * (x_isz + o_isz) + weight_bytes

    kernel = functools.partial(_autoencoder_kernel, compute_dtype=compute_dtype)

    out_p = pl.pallas_call(
        kernel,
        out_shape=jax.ShapeDtypeStruct((Bp, Dp), out_dtype),
        grid_spec=pltpu.PrefetchScalarGridSpec(
            num_scalar_prefetch=0,
            grid=grid,
            in_specs=[
                pl.BlockSpec((tbp, Dp), lambda i: (i, 0)),
                full_spec(w12), full_spec(b12),
                full_spec(w34), full_spec(b34),
            ],
            out_specs=pl.BlockSpec((tbp, Dp), lambda i: (i, 0)),
        ),
        compiler_params=pltpu.CompilerParams(
            dimension_semantics=("parallel",),
            vmem_limit_bytes=vmem_limit),
        cost_estimate=pl.CostEstimate(
            flops=int(flops), transcendentals=0, bytes_accessed=int(bytes_accessed)),
    )(x_p, w12, b12, w34, b34)
    return out_p.reshape(B, D)


def init_params(key, input_dim, encoding_dim, dtype=jnp.float32):
    """Deterministic init mirroring nn.Linear default (uniform +-1/sqrt(fan_in)).

    Weights stored as (in_features, out_features)."""
    half = encoding_dim // 2
    dims = [
        ("w1", "b1", input_dim, encoding_dim),
        ("w2", "b2", encoding_dim, half),
        ("w3", "b3", half, encoding_dim),
        ("w4", "b4", encoding_dim, input_dim),
    ]
    params = {}
    keys = jax.random.split(key, 2 * len(dims))
    for idx, (wname, bname, fan_in, fan_out) in enumerate(dims):
        bound = 1.0 / jnp.sqrt(jnp.asarray(fan_in, dtype))
        params[wname] = jax.random.uniform(
            keys[2 * idx], (fan_in, fan_out), dtype, minval=-bound, maxval=bound)
        params[bname] = jax.random.uniform(
            keys[2 * idx + 1], (1, fan_out), dtype, minval=-bound, maxval=bound)
    return params


def reference_forward(x, params, compute_dtype=jnp.bfloat16):
    """Plain-JAX reference matching the kernel's precision path:
    f32 weight fold, bf16 matmuls with f32 accumulation, f32 bias/ReLU."""
    w12, b12, w34, b34 = _fold_params(params, compute_dtype, pack=1)
    cd = compute_dtype
    h = jnp.dot(x.astype(cd), w12, preferred_element_type=jnp.float32) + b12
    h = jnp.maximum(h, 0.0)
    y = jnp.dot(h.astype(cd), w34, preferred_element_type=jnp.float32) + b34
    return y.astype(x.dtype)


def reference_forward_f32(x, params):
    """Faithful two-stage f32 reference mirroring the PyTorch module exactly."""
    h = x @ params["w1"] + params["b1"]
    h = h @ params["w2"] + params["b2"]
    h = jnp.maximum(h, 0.0)
    h = h @ params["w3"] + params["b3"]
    return h @ params["w4"] + params["b4"]


if __name__ == "__main__":
    # Small shapes consistent with the module: batch=8, input_dim=64, encoding_dim=32
    B, INPUT_DIM, ENCODING_DIM = 8, 64, 32

    key = jax.random.PRNGKey(0)
    pkey, xkey, x2key = jax.random.split(key, 3)
    params = init_params(pkey, INPUT_DIM, ENCODING_DIM)
    x = jax.random.normal(xkey, (B, INPUT_DIM), jnp.float32)

    out = jax.block_until_ready(autoencoder_forward(x, params))
    ref = reference_forward(x, params)
    ref_f32 = reference_forward_f32(x, params)
    assert out.shape == (B, INPUT_DIM)
    assert out.dtype == jnp.float32
    assert jnp.allclose(out, ref, atol=2e-3, rtol=2e-3), "mismatch vs matched-precision reference"
    assert jnp.allclose(out, ref_f32, atol=1e-1, rtol=1e-1), "mismatch vs f32 module reference"

    # Exercise the tiled / pipelined path: multiple grid steps + a ragged last block.
    B2 = 40
    x2 = jax.random.normal(x2key, (B2, INPUT_DIM), jnp.float32)
    out2 = jax.block_until_ready(autoencoder_forward(x2, params, block_b=16))
    ref2 = reference_forward(x2, params)
    assert out2.shape == (B2, INPUT_DIM)
    assert jnp.allclose(out2, ref2, atol=2e-3, rtol=2e-3), "tiled mismatch vs reference"

    print("KERNEL_OK")
</pallas_src>

<mosaic_0001>
module attributes {stable_mosaic.version = 11 : i64} {
  func.func @_autoencoder_kernel(%arg0: i32, %arg1: memref<4x128xf32, #tpu.memory_space<vmem>>, %arg2: memref<128x32xbf16, #tpu.memory_space<vmem>>, %arg3: memref<1x32xf32, #tpu.memory_space<vmem>>, %arg4: memref<32x128xbf16, #tpu.memory_space<vmem>>, %arg5: memref<1x128xf32, #tpu.memory_space<vmem>>, %arg6: memref<4x128xf32, #tpu.memory_space<vmem>>) attributes {dimension_semantics = [#tpu.dimension_semantics<parallel>], iteration_bounds = array<i64: 1>, scalar_prefetch = 0 : i64, scratch_operands = 0 : i64, tpu.core_type = #tpu.core_type<tc>, window_params = [{transform_indices = @transform_0, window_bounds = array<i64: 4, 128>}, {pipeline_mode = #tpu.pipeline_mode<synchronous>, transform_indices = @transform_1, window_bounds = array<i64: 128, 32>}, {pipeline_mode = #tpu.pipeline_mode<synchronous>, transform_indices = @transform_2, window_bounds = array<i64: 1, 32>}, {pipeline_mode = #tpu.pipeline_mode<synchronous>, transform_indices = @transform_3, window_bounds = array<i64: 32, 128>}, {pipeline_mode = #tpu.pipeline_mode<synchronous>, transform_indices = @transform_4, window_bounds = array<i64: 1, 128>}, {transform_indices = @transform_5, window_bounds = array<i64: 4, 128>}]} {
    %c0 = arith.constant 0 : index
    %c0_0 = arith.constant 0 : index
    %0 = vector.load %arg1[%c0, %c0_0] : memref<4x128xf32, #tpu.memory_space<vmem>>, vector<4x128xf32>
    %1 = arith.truncf %0 : vector<4x128xf32> to vector<4x128xbf16>
    %c0_1 = arith.constant 0 : index
    %c0_2 = arith.constant 0 : index
    %2 = vector.load %arg2[%c0_1, %c0_2] : memref<128x32xbf16, #tpu.memory_space<vmem>>, vector<128x32xbf16>
    %cst = arith.constant dense<0.000000e+00> : vector<4x32xf32>
    %3 = tpu.matmul %1, %2, %cst {dimension_numbers = #tpu.dot_dimension_numbers<[1], [0], [0], [1], [0, 0, 1, 1], [], []>} : vector<4x128xbf16>, vector<128x32xbf16>, vector<4x32xf32> -> vector<4x32xf32>
    %c0_3 = arith.constant 0 : index
    %c0_4 = arith.constant 0 : index
    %4 = vector.load %arg3[%c0_3, %c0_4] : memref<1x32xf32, #tpu.memory_space<vmem>>, vector<1x32xf32>
    %5 = vector.broadcast %4 : vector<1x32xf32> to vector<4x32xf32>
    %6 = arith.addf %3, %5 : vector<4x32xf32>
    %cst_5 = arith.constant 0.000000e+00 : f32
    %7 = vector.broadcast %cst_5 : f32 to vector<4x32xf32>
    %8 = arith.maximumf %6, %7 : vector<4x32xf32>
    %9 = arith.truncf %8 : vector<4x32xf32> to vector<4x32xbf16>
    %c0_6 = arith.constant 0 : index
    %c0_7 = arith.constant 0 : index
    %10 = vector.load %arg4[%c0_6, %c0_7] : memref<32x128xbf16, #tpu.memory_space<vmem>>, vector<32x128xbf16>
    %cst_8 = arith.constant dense<0.000000e+00> : vector<4x128xf32>
    %11 = tpu.matmul %9, %10, %cst_8 {dimension_numbers = #tpu.dot_dimension_numbers<[1], [0], [0], [1], [0, 0, 1, 1], [], []>} : vector<4x32xbf16>, vector<32x128xbf16>, vector<4x128xf32> -> vector<4x128xf32>
    %c0_9 = arith.constant 0 : index
    %c0_10 = arith.constant 0 : index
    %12 = vector.load %arg5[%c0_9, %c0_10] : memref<1x128xf32, #tpu.memory_space<vmem>>, vector<1x128xf32>
    %13 = vector.broadcast %12 : vector<1x128xf32> to vector<4x128xf32>
    %14 = arith.addf %11, %13 : vector<4x128xf32>
    %c0_11 = arith.constant 0 : index
    %c0_12 = arith.constant 0 : index
    %15 = vector.load %arg6[%c0_11, %c0_12] : memref<4x128xf32, #tpu.memory_space<vmem>>, vector<4x128xf32>
    tpu.vector_store %arg6[%c0_11, %c0_12], %14 {strides = array<i32>} : memref<4x128xf32, #tpu.memory_space<vmem>>, vector<4x128xf32>,
    return
  }
  func.func @transform_0(%arg0: i32) -> (i32, i32) {
    %c0_i32 = arith.constant 0 : i32
    %c0_i32_0 = arith.constant 0 : i32
    return %arg0, %c0_i32 : i32, i32
  }
  func.func @transform_1(%arg0: i32) -> (i32, i32) {
    %c0_i32 = arith.constant 0 : i32
    %c0_i32_0 = arith.constant 0 : i32
    %c0_i32_1 = arith.constant 0 : i32
    return %c0_i32, %c0_i32_0 : i32, i32
  }
  func.func @transform_2(%arg0: i32) -> (i32, i32) {
    %c0_i32 = arith.constant 0 : i32
    %c0_i32_0 = arith.constant 0 : i32
    %c0_i32_1 = arith.constant 0 : i32
    return %c0_i32, %c0_i32_0 : i32, i32
  }
  func.func @transform_3(%arg0: i32) -> (i32, i32) {
    %c0_i32 = arith.constant 0 : i32
    %c0_i32_0 = arith.constant 0 : i32
    %c0_i32_1 = arith.constant 0 : i32
    return %c0_i32, %c0_i32_0 : i32, i32
  }
  func.func @transform_4(%arg0: i32) -> (i32, i32) {
    %c0_i32 = arith.constant 0 : i32
    %c0_i32_0 = arith.constant 0 : i32
    %c0_i32_1 = arith.constant 0 : i32
    return %c0_i32, %c0_i32_0 : i32, i32
  }
  func.func @transform_5(%arg0: i32) -> (i32, i32) {
    %c0_i32 = arith.constant 0 : i32
    %c0_i32_0 = arith.constant 0 : i32
    return %arg0, %c0_i32 : i32, i32
  }
}

</mosaic_0001>

<bundles_post_ra>
// kernel: autoencoder_forward.1
= control target key start
LH: loop header
LB: loop body
LE: loop exit
PB: predicated region body
PF: predicated region fallthrough
CT: control target
= control target key end

     0   :  { %v273_v0 = vmov 0.0   ;;  %vm274_vm0 = vmmov 0   ;;  %vm159_vm1 = vcmask 261120   ;;  %s347_s1 = inlined_call_operand.vmem [shape: bf16[128,32], index: 1, kind: input, shape index: {}]   ;;  %s348_s0 = inlined_call_operand.vmem [shape: f32[4,128], index: 0, kind: input, shape index: {}]   ;;  %s349_s3 = inlined_call_operand.vmem [shape: bf16[32,128], index: 3, kind: input, shape index: {}]   ;;  %s350_s2 = inlined_call_operand.vmem [shape: f32[1,32], index: 2, kind: input, shape index: {}]   ;;  %s351_s4 = inlined_call_operand.vmem [shape: f32[1,128], index: 4, kind: input, shape index: {}]   ;;  %s352_s5 = inlined_call_operand.vmem [shape: f32[4,128], index: 5, kind: output, shape index: {}]  }
   0x1   :  { %233 = vmatprep.subr.bf16.mxu0 %v273_v0  ;;  %v263_v1 = vld [vmem:[%s347_s1 + $0x38] sm:$0xff]   ;;  %249 = vmatprep.mubr.msk.bf16.mxu0 %vm274_vm0, %v273_v0  ;;  %v264_v2 = vld [vmem:[%s347_s1 + $0x30] sm:$0xff]   ;;  %v265_v3 = vld [vmem:[%s347_s1 + $0x28] sm:$0xff]  }
   0x2   :  { %253 = vmatprep.subr.bf16.mxu1 %v273_v0  ;;  %257 = vmatprep.mubr.msk.bf16.mxu1 %vm274_vm0, %v273_v0  ;;  %v266_v4 = vld [vmem:[%s347_s1 + $0x20] sm:$0xff]   ;;  %v267_v5 = vld [vmem:[%s347_s1 + $0x18] sm:$0xff]   ;;  %v268_v6 = vld [vmem:[%s347_s1 + $0x10] sm:$0xff]  }
   0x3   :  { %234 = vmatpush3.bf16.msra.mxu0 %v263_v1  ;;  %v269_v7 = vld [vmem:[%s347_s1 + $0x8] sm:$0xff]   ;;  %v270_v8 = vld [vmem:[%s347_s1] sm:$0xff]  }
   0x4   :  { %235 = vmatprep.subr.bf16.mxu0 %v273_v0  ;;  %v21_v9 = vld [vmem:[%s348_s0] sm:$0xf]  ;;  %v271_v11 = vld [vmem:[%s349_s3 + $0x8] sm:$0xff]  }
   0x5   :  { %v22_v10 = vpack.c.bf16 %v21_v9, %v21_v9  ;;  %254 = vmatpush3.bf16.msra.mxu1 %v271_v11  ;;  %v272_v12 = vld [vmem:[%s349_s3] sm:$0xff]  }
   0x6   :  { %255 = vmatprep.subr.bf16.mxu1 %v273_v0  ;;  %v208_v13 = vld [vmem:[%s350_s2] ss:$0 sm:$0xff] }
   0x7   :  { %236 = vmatpush3.bf16.msra.mxu0 %v264_v2  ;;  %v217_v21 = vld [vmem:[%s351_s4] ss:$0 sm:$0xff] }
   0x8   :  { %237 = vmatprep.subr.bf16.mxu0 %v273_v0 }
   0x9   :  { %256 = vmatpush3.bf16.msra.mxu1 %v272_v12 }
   0xb   :  { %238 = vmatpush3.bf16.msra.mxu0 %v265_v3 }
   0xc   :  { %239 = vmatprep.subr.bf16.mxu0 %v273_v0 }
   0xf   :  { %240 = vmatpush3.bf16.msra.mxu0 %v266_v4 }
  0x10   :  { %241 = vmatprep.subr.bf16.mxu0 %v273_v0 }
  0x13   :  { %242 = vmatpush3.bf16.msra.mxu0 %v267_v5 }
  0x14   :  { %243 = vmatprep.subr.bf16.mxu0 %v273_v0 }
  0x17   :  { %244 = vmatpush3.bf16.msra.mxu0 %v268_v6 }
  0x18   :  { %245 = vmatprep.subr.bf16.mxu0 %v273_v0 }
  0x1b   :  { %246 = vmatpush3.bf16.msra.mxu0 %v269_v7 }
  0x1c   :  { %247 = vmatprep.subr.bf16.mxu0 %v273_v0 }
  0x1f   :  { %248 = vmatpush3.bf16.msra.mxu0 %v270_v8 }
  0x22   :  { %250 = vmatmul.mubr.bf16.vlgmr.msra.gmra.mxu0 %v22_v10 }
  0xe2   :  { %v128_v14 = vpop.f32.mrf.mxu0 }
  0xe3   :  { %v129_v15 = vadd.f32 %v208_v13, %v128_v14 }
  0xe4   :  { %v251_v16 = vpop.f32.mrf.mxu0 }
  0xe5   :  { %v134_v17 = vmax.f32 %v129_v15, 0.0 }
  0xe6   :  { %v131_v18 = vpop.f32.mrf.mxu0 }
  0xe7   :  { %v135_v19 = vpack.c.bf16 %v134_v17, %v134_v17 }
  0xe8   :  { %v252_v20 = vpop.f32.mrf.mxu0 }
  0xe9   :  { %258 = vmatmul.mubr.msk.bf16.vlgmr.msra.gmra.mxu1 %vm159_vm1, %v135_v19 }
 0x1a9   :  { %v197_v22 = vpop.f32.mrf.mxu1 }
 0x1aa   :  { %v198_v23 = vadd.f32 %v217_v21, %v197_v22 }
 0x1ab   :  { %v259_v24 = vpop.f32.mrf.mxu1 }
 0x1ac   :  { %203 = vst [vmem:[%s352_s5] sm:$0xf] %v198_v23 }
 0x1ad   :  { %v200_v25 = vpop.f32.mrf.mxu1 }
 0x1af   :  { %v260_v26 = vpop.f32.mrf.mxu1 }

</bundles_post_ra>
